<compile_context>
chip_gen: v6e
topology: v6e:2x2x1
jax: 0.10.0
libtpu: 0.0.40
codegen_flags: <defaults>
</compile_context>

<pallas_src>
import jax
import jax.numpy as jnp
from jax.experimental import pallas as pl
from jax.experimental.pallas import tpu as pltpu

LANE = 128                   # TPU lane width
OUT = 2                      # true number of logits
H1, H2, H3 = 256, 128, 128   # kernel-side layer widths (layer 3: 64 -> 128 zero-padded)


def _cdiv(a, b):
    return -(-a // b)


def _round_up(x, m):
    return ((x + m - 1) // m) * m


def _mlp_kernel(x_ref, w1_ref, b1_ref, w2_ref, b2_ref, w3_ref, b3_ref,
                w4_ref, b4_ref, o_ref):
    cdt = w1_ref.dtype  # MXU compute dtype (bf16 by default)
    # Layer 1: Linear(D, 256) + ReLU.  x arrives f32 straight from HBM; cast to
    # the compute dtype here (no wrapper-side cast round trip).  Dropout = id.
    h = jnp.dot(x_ref[...].astype(cdt), w1_ref[...],
                preferred_element_type=jnp.float32)
    h = jnp.maximum(h + b1_ref[...], 0.0).astype(cdt)
    # Layer 2: Linear(256, 128) + ReLU
    h = jnp.dot(h, w2_ref[...], preferred_element_type=jnp.float32)
    h = jnp.maximum(h + b2_ref[...], 0.0).astype(cdt)
    # Layer 3: Linear(128, 64) + ReLU, hidden dim zero-padded to 128 lanes
    # (padded units are ReLU(0) = 0 and hit zero rows of w4 -> numerics exact).
    h = jnp.dot(h, w3_ref[...], preferred_element_type=jnp.float32)
    h = jnp.maximum(h + b3_ref[...], 0.0).astype(cdt)
    # Layer 4: Linear(64, 2) padded to 128 output lanes -> lane-dense store.
    h = jnp.dot(h, w4_ref[...], preferred_element_type=jnp.float32)
    o_ref[...] = (h + b4_ref[...]).astype(o_ref.dtype)


def prepare_params(params, compute_dtype=jnp.bfloat16):
    """One-time parameter prep (call at init, NOT per forward call):
    bf16 weights / f32 biases, layer-3 hidden dim and layer-4 output dim
    zero-padded to 128 lanes."""
    w1, b1, w2, b2, w3, b3, w4, b4 = params
    w1c = w1.astype(compute_dtype)
    w2c = w2.astype(compute_dtype)
    w3p = jnp.zeros((w3.shape[0], H3), compute_dtype).at[:, :w3.shape[1]].set(
        w3.astype(compute_dtype))
    w4p = jnp.zeros((H3, LANE), compute_dtype).at[:w4.shape[0], :OUT].set(
        w4.astype(compute_dtype))
    b1c = b1.reshape(1, -1).astype(jnp.float32)
    b2c = b2.reshape(1, -1).astype(jnp.float32)
    b3p = jnp.zeros((1, H3), jnp.float32).at[:, :b3.size].set(
        b3.reshape(1, -1).astype(jnp.float32))
    b4p = jnp.zeros((1, LANE), jnp.float32).at[:, :OUT].set(
        b4.reshape(1, -1).astype(jnp.float32))
    return (w1c, b1c, w2c, b2c, w3p, b3p, w4p, b4p)


def _vmem_capacity_bytes():
    try:
        return int(pltpu.get_tpu_info().vmem_capacity_bytes)
    except Exception:
        return 64 * 1024 * 1024   # conservative (v7x per-TensorCore)


def _choose_batch_tile(B, D, batch_tile, vmem_cap):
    """Pick a VMEM-aware, 128-aligned batch tile with minimal tail padding and
    (when possible) an even step count for two-TensorCore sharding."""
    # Per-row VMEM bytes: double-buffered f32 x tile + its in-kernel bf16 copy
    # + double-buffered f32 output tile + f32 intermediate headroom.
    per_row = 2 * D * 4 + D * 2 + 2 * LANE * 4 + 4 * H1 * 4
    fixed = (D * H1 + H1 * H2 + H2 * H3 + H3 * LANE) * 2 \
            + (H1 + H2 + H3 + LANE) * 4
    budget = int(0.70 * vmem_cap)
    bt_vmem = max(((budget - fixed) // per_row // 128) * 128, 128)

    if batch_tile is None:
        # 128 MiB parts (v5e/v6e) take 1024-row tiles; 64 MiB v7x gets 512.
        batch_tile = 1024 if vmem_cap >= 96 * 1024 * 1024 else 512
    bt_cap = max(_round_up(min(batch_tile, bt_vmem), 128), 128)

    n = _cdiv(B, bt_cap)
    if n == 1 and B > 256:
        n = 2                        # let multi-TC parts shard the batch axis
    bt = min(_round_up(_cdiv(B, n), 128), bt_cap)
    n = _cdiv(B, bt)
    # Prefer an even step count so two TensorCores split the grid evenly.
    if n > 1 and n % 2 == 1:
        bt2 = _round_up(_cdiv(B, n + 1), 128)
        if bt2 >= 128 and _cdiv(B, bt2) % 2 == 0:
            bt, n = bt2, _cdiv(B, bt2)
    return bt, n


def saplma_probe_mlp(x, prepared_params, *, batch_tile=None):
    """Fused SAPLMA probe MLP forward.
    x: [B, input_size] float32 -> [B, 2] float32 logits.
    `prepared_params` must come from prepare_params()."""
    w1, b1, w2, b2, w3, b3, w4, b4 = prepared_params
    B, D = x.shape
    assert w1.shape[0] == D, "input_size mismatch with prepared params"

    vmem_cap = _vmem_capacity_bytes()
    bt, n_steps = _choose_batch_tile(B, D, batch_tile, vmem_cap)

    cdt_bytes = jnp.dtype(w1.dtype).itemsize
    w_elems = int(w1.size + w2.size + w3.size + w4.size)
    b_elems = int(b1.size + b2.size + b3.size + b4.size)

    # Explicit VMEM budget (generation-aware).
    vmem_est = (2 * bt * D * 4            # double-buffered f32 x tile
                + bt * D * cdt_bytes      # in-kernel bf16 copy of the tile
                + 2 * bt * LANE * 4       # double-buffered f32 output tile
                + w_elems * cdt_bytes     # single-buffered weights
                + b_elems * 4             # biases
                + 4 * bt * H1 * 4)        # f32 intermediates headroom
    vmem_limit = int(min(max(int(1.4 * vmem_est), 32 * 1024 * 1024),
                         int(0.9 * vmem_cap)))

    # Scheduler hint.
    flops = 2 * n_steps * bt * (D * H1 + H1 * H2 + H2 * H3 + H3 * LANE)
    bytes_accessed = B * D * 4 + w_elems * cdt_bytes + b_elems * 4 + B * LANE * 4
    cost = pl.CostEstimate(flops=flops, transcendentals=0,
                           bytes_accessed=bytes_accessed)

    def const_spec(shape):
        # Grid-invariant operand: constant block index, single-buffered VMEM.
        return pl.BlockSpec(shape, lambda i: (0, 0),
                            pipeline_mode=pl.Buffered(1))

    out = pl.pallas_call(
        _mlp_kernel,
        out_shape=jax.ShapeDtypeStruct((B, LANE), jnp.float32),
        grid_spec=pltpu.PrefetchScalarGridSpec(
            num_scalar_prefetch=0,
            grid=(n_steps,),
            in_specs=[
                pl.BlockSpec((bt, D), lambda i: (i, 0)),   # f32 x tile
                const_spec(w1.shape), const_spec(b1.shape),
                const_spec(w2.shape), const_spec(b2.shape),
                const_spec(w3.shape), const_spec(b3.shape),
                const_spec(w4.shape), const_spec(b4.shape),
            ],
            out_specs=pl.BlockSpec((bt, LANE), lambda i: (i, 0)),
        ),
        compiler_params=pltpu.CompilerParams(
            # Batch axis is embarrassingly parallel; switch to
            # pltpu.CORE_PARALLEL if profiling shows an idle TensorCore on v7x.
            dimension_semantics=("parallel",),
            vmem_limit_bytes=vmem_limit,
        ),
        cost_estimate=cost,
    )(x.astype(jnp.float32), w1, b1, w2, b2, w3, b3, w4, b4)

    return out[:, :OUT]


def init_params(input_size, key):
    """Deterministic parameter init (PyTorch Linear-style uniform bounds).
    Weights are [in_features, out_features]."""
    sizes = [(input_size, 256), (256, 128), (128, 64), (64, 2)]
    params = []
    for (fan_in, fan_out) in sizes:
        key, kw, kb = jax.random.split(key, 3)
        bound = 1.0 / jnp.sqrt(fan_in)
        w = jax.random.uniform(kw, (fan_in, fan_out), jnp.float32, -bound, bound)
        b = jax.random.uniform(kb, (1, fan_out), jnp.float32, -bound, bound)
        params += [w, b]
    return tuple(params)


def reference_mlp(x, params, compute_dtype=jnp.bfloat16):
    """Precision-matched JAX reference (bf16 operands, f32 accumulation)."""
    w1, b1, w2, b2, w3, b3, w4, b4 = params
    h = x
    for w, b in ((w1, b1), (w2, b2), (w3, b3)):
        h = jnp.dot(h.astype(compute_dtype), w.astype(compute_dtype),
                    preferred_element_type=jnp.float32)
        h = jnp.maximum(h + b.astype(jnp.float32), 0.0)
    h = jnp.dot(h.astype(compute_dtype), w4.astype(compute_dtype),
                preferred_element_type=jnp.float32)
    return h + b4.astype(jnp.float32)


if __name__ == "__main__":
    key = jax.random.PRNGKey(0)
    key, kx = jax.random.split(key)

    batch, input_size = 6, 32   # ragged batch exercises the edge-block path
    x = jax.random.normal(kx, (batch, input_size), dtype=jnp.float32)
    raw_params = init_params(input_size, key)
    params = prepare_params(raw_params)   # one-time, init-side prep

    out = jax.block_until_ready(saplma_probe_mlp(x, params))
    ref = reference_mlp(x, raw_params)

    assert out.shape == (batch, OUT)
    err = float(jnp.max(jnp.abs(out - ref)))
    assert jnp.allclose(out, ref, atol=1e-2, rtol=1e-2), f"max abs err {err}"
    print("KERNEL_OK")
</pallas_src>

<mosaic_0001>
module attributes {stable_mosaic.version = 11 : i64} {
  func.func @_mlp_kernel(%arg0: i32, %arg1: memref<128x32xf32, #tpu.memory_space<vmem>>, %arg2: memref<32x256xbf16, #tpu.memory_space<vmem>>, %arg3: memref<1x256xf32, #tpu.memory_space<vmem>>, %arg4: memref<256x128xbf16, #tpu.memory_space<vmem>>, %arg5: memref<1x128xf32, #tpu.memory_space<vmem>>, %arg6: memref<128x128xbf16, #tpu.memory_space<vmem>>, %arg7: memref<1x128xf32, #tpu.memory_space<vmem>>, %arg8: memref<128x128xbf16, #tpu.memory_space<vmem>>, %arg9: memref<1x128xf32, #tpu.memory_space<vmem>>, %arg10: memref<128x128xf32, #tpu.memory_space<vmem>>) attributes {dimension_semantics = [#tpu.dimension_semantics<parallel>], iteration_bounds = array<i64: 1>, scalar_prefetch = 0 : i64, scratch_operands = 0 : i64, tpu.core_type = #tpu.core_type<tc>, window_params = [{transform_indices = @transform_0, window_bounds = array<i64: 128, 32>}, {pipeline_mode = #tpu.pipeline_mode<synchronous>, transform_indices = @transform_1, window_bounds = array<i64: 32, 256>}, {pipeline_mode = #tpu.pipeline_mode<synchronous>, transform_indices = @transform_2, window_bounds = array<i64: 1, 256>}, {pipeline_mode = #tpu.pipeline_mode<synchronous>, transform_indices = @transform_3, window_bounds = array<i64: 256, 128>}, {pipeline_mode = #tpu.pipeline_mode<synchronous>, transform_indices = @transform_4, window_bounds = array<i64: 1, 128>}, {pipeline_mode = #tpu.pipeline_mode<synchronous>, transform_indices = @transform_5, window_bounds = array<i64: 128, 128>}, {pipeline_mode = #tpu.pipeline_mode<synchronous>, transform_indices = @transform_6, window_bounds = array<i64: 1, 128>}, {pipeline_mode = #tpu.pipeline_mode<synchronous>, transform_indices = @transform_7, window_bounds = array<i64: 128, 128>}, {pipeline_mode = #tpu.pipeline_mode<synchronous>, transform_indices = @transform_8, window_bounds = array<i64: 1, 128>}, {transform_indices = @transform_9, window_bounds = array<i64: 128, 128>}]} {
    %c0 = arith.constant 0 : index
    %c0_0 = arith.constant 0 : index
    %0 = vector.load %arg1[%c0, %c0_0] : memref<128x32xf32, #tpu.memory_space<vmem>>, vector<128x32xf32>
    %1 = arith.truncf %0 : vector<128x32xf32> to vector<128x32xbf16>
    %c0_1 = arith.constant 0 : index
    %c0_2 = arith.constant 0 : index
    %2 = vector.load %arg2[%c0_1, %c0_2] : memref<32x256xbf16, #tpu.memory_space<vmem>>, vector<32x256xbf16>
    %cst = arith.constant dense<0.000000e+00> : vector<128x256xf32>
    %3 = tpu.matmul %1, %2, %cst {dimension_numbers = #tpu.dot_dimension_numbers<[1], [0], [0], [1], [0, 0, 1, 1], [], []>} : vector<128x32xbf16>, vector<32x256xbf16>, vector<128x256xf32> -> vector<128x256xf32>
    %c0_3 = arith.constant 0 : index
    %c0_4 = arith.constant 0 : index
    %4 = vector.load %arg3[%c0_3, %c0_4] : memref<1x256xf32, #tpu.memory_space<vmem>>, vector<1x256xf32>
    %5 = vector.broadcast %4 : vector<1x256xf32> to vector<128x256xf32>
    %6 = arith.addf %3, %5 : vector<128x256xf32>
    %cst_5 = arith.constant 0.000000e+00 : f32
    %7 = vector.broadcast %cst_5 : f32 to vector<128x256xf32>
    %8 = arith.maximumf %6, %7 : vector<128x256xf32>
    %9 = arith.truncf %8 : vector<128x256xf32> to vector<128x256xbf16>
    %c0_6 = arith.constant 0 : index
    %c0_7 = arith.constant 0 : index
    %10 = vector.load %arg4[%c0_6, %c0_7] : memref<256x128xbf16, #tpu.memory_space<vmem>>, vector<256x128xbf16>
    %cst_8 = arith.constant dense<0.000000e+00> : vector<128x128xf32>
    %11 = tpu.matmul %9, %10, %cst_8 {dimension_numbers = #tpu.dot_dimension_numbers<[1], [0], [0], [1], [0, 0, 1, 1], [], []>} : vector<128x256xbf16>, vector<256x128xbf16>, vector<128x128xf32> -> vector<128x128xf32>
    %c0_9 = arith.constant 0 : index
    %c0_10 = arith.constant 0 : index
    %12 = vector.load %arg5[%c0_9, %c0_10] : memref<1x128xf32, #tpu.memory_space<vmem>>, vector<1x128xf32>
    %13 = vector.broadcast %12 : vector<1x128xf32> to vector<128x128xf32>
    %14 = arith.addf %11, %13 : vector<128x128xf32>
    %cst_11 = arith.constant 0.000000e+00 : f32
    %15 = vector.broadcast %cst_11 : f32 to vector<128x128xf32>
    %16 = arith.maximumf %14, %15 : vector<128x128xf32>
    %17 = arith.truncf %16 : vector<128x128xf32> to vector<128x128xbf16>
    %c0_12 = arith.constant 0 : index
    %c0_13 = arith.constant 0 : index
    %18 = vector.load %arg6[%c0_12, %c0_13] : memref<128x128xbf16, #tpu.memory_space<vmem>>, vector<128x128xbf16>
    %cst_14 = arith.constant dense<0.000000e+00> : vector<128x128xf32>
    %19 = tpu.matmul %17, %18, %cst_14 {dimension_numbers = #tpu.dot_dimension_numbers<[1], [0], [0], [1], [0, 0, 1, 1], [], []>} : vector<128x128xbf16>, vector<128x128xbf16>, vector<128x128xf32> -> vector<128x128xf32>
    %c0_15 = arith.constant 0 : index
    %c0_16 = arith.constant 0 : index
    %20 = vector.load %arg7[%c0_15, %c0_16] : memref<1x128xf32, #tpu.memory_space<vmem>>, vector<1x128xf32>
    %21 = vector.broadcast %20 : vector<1x128xf32> to vector<128x128xf32>
    %22 = arith.addf %19, %21 : vector<128x128xf32>
    %cst_17 = arith.constant 0.000000e+00 : f32
    %23 = vector.broadcast %cst_17 : f32 to vector<128x128xf32>
    %24 = arith.maximumf %22, %23 : vector<128x128xf32>
    %25 = arith.truncf %24 : vector<128x128xf32> to vector<128x128xbf16>
    %c0_18 = arith.constant 0 : index
    %c0_19 = arith.constant 0 : index
    %26 = vector.load %arg8[%c0_18, %c0_19] : memref<128x128xbf16, #tpu.memory_space<vmem>>, vector<128x128xbf16>
    %cst_20 = arith.constant dense<0.000000e+00> : vector<128x128xf32>
    %27 = tpu.matmul %25, %26, %cst_20 {dimension_numbers = #tpu.dot_dimension_numbers<[1], [0], [0], [1], [0, 0, 1, 1], [], []>} : vector<128x128xbf16>, vector<128x128xbf16>, vector<128x128xf32> -> vector<128x128xf32>
    %c0_21 = arith.constant 0 : index
    %c0_22 = arith.constant 0 : index
    %28 = vector.load %arg9[%c0_21, %c0_22] : memref<1x128xf32, #tpu.memory_space<vmem>>, vector<1x128xf32>
    %29 = vector.broadcast %28 : vector<1x128xf32> to vector<128x128xf32>
    %30 = arith.addf %27, %29 : vector<128x128xf32>
    %c0_23 = arith.constant 0 : index
    %c0_24 = arith.constant 0 : index
    %31 = vector.load %arg10[%c0_23, %c0_24] : memref<128x128xf32, #tpu.memory_space<vmem>>, vector<128x128xf32>
    tpu.vector_store %arg10[%c0_23, %c0_24], %30 {strides = array<i32>} : memref<128x128xf32, #tpu.memory_space<vmem>>, vector<128x128xf32>,
    return
  }
  func.func @transform_0(%arg0: i32) -> (i32, i32) {
    %c0_i32 = arith.constant 0 : i32
    %c0_i32_0 = arith.constant 0 : i32
    return %arg0, %c0_i32 : i32, i32
  }
  func.func @transform_1(%arg0: i32) -> (i32, i32) {
    %c0_i32 = arith.constant 0 : i32
    %c0_i32_0 = arith.constant 0 : i32
    %c0_i32_1 = arith.constant 0 : i32
    return %c0_i32, %c0_i32_0 : i32, i32
  }
  func.func @transform_2(%arg0: i32) -> (i32, i32) {
    %c0_i32 = arith.constant 0 : i32
    %c0_i32_0 = arith.constant 0 : i32
    %c0_i32_1 = arith.constant 0 : i32
    return %c0_i32, %c0_i32_0 : i32, i32
  }
  func.func @transform_3(%arg0: i32) -> (i32, i32) {
    %c0_i32 = arith.constant 0 : i32
    %c0_i32_0 = arith.constant 0 : i32
    %c0_i32_1 = arith.constant 0 : i32
    return %c0_i32, %c0_i32_0 : i32, i32
  }
  func.func @transform_4(%arg0: i32) -> (i32, i32) {
    %c0_i32 = arith.constant 0 : i32
    %c0_i32_0 = arith.constant 0 : i32
    %c0_i32_1 = arith.constant 0 : i32
    return %c0_i32, %c0_i32_0 : i32, i32
  }
  func.func @transform_5(%arg0: i32) -> (i32, i32) {
    %c0_i32 = arith.constant 0 : i32
    %c0_i32_0 = arith.constant 0 : i32
    %c0_i32_1 = arith.constant 0 : i32
    return %c0_i32, %c0_i32_0 : i32, i32
  }
  func.func @transform_6(%arg0: i32) -> (i32, i32) {
    %c0_i32 = arith.constant 0 : i32
    %c0_i32_0 = arith.constant 0 : i32
    %c0_i32_1 = arith.constant 0 : i32
    return %c0_i32, %c0_i32_0 : i32, i32
  }
  func.func @transform_7(%arg0: i32) -> (i32, i32) {
    %c0_i32 = arith.constant 0 : i32
    %c0_i32_0 = arith.constant 0 : i32
    %c0_i32_1 = arith.constant 0 : i32
    return %c0_i32, %c0_i32_0 : i32, i32
  }
  func.func @transform_8(%arg0: i32) -> (i32, i32) {
    %c0_i32 = arith.constant 0 : i32
    %c0_i32_0 = arith.constant 0 : i32
    %c0_i32_1 = arith.constant 0 : i32
    return %c0_i32, %c0_i32_0 : i32, i32
  }
  func.func @transform_9(%arg0: i32) -> (i32, i32) {
    %c0_i32 = arith.constant 0 : i32
    %c0_i32_0 = arith.constant 0 : i32
    return %arg0, %c0_i32 : i32, i32
  }
}

</mosaic_0001>

<bundles_post_ra>
// kernel: tpu_custom_call.1
= control target key start
LH: loop header
LB: loop body
LE: loop exit
PB: predicated region body
PF: predicated region fallthrough
CT: control target
= control target key end

     0   :  { %14 = vsyncpa [#allocation3], 0  ;;  %s1590_s0 = inlined_call_operand.hbm [shape: f32[6,32], index: 0, kind: input, shape index: {}]   ;;  %s1591_s1 = inlined_call_operand.hbm [shape: bf16[32,256], index: 1, kind: input, shape index: {}]   ;;  %s1592_s2 = inlined_call_operand.vmem [shape: f32[1,256], index: 2, kind: input, shape index: {}]   ;;  %s1593_s3 = inlined_call_operand.hbm [shape: bf16[256,128], index: 3, kind: input, shape index: {}]   ;;  %s1594_s4 = inlined_call_operand.vmem [shape: f32[1,128], index: 4, kind: input, shape index: {}]   ;;  %s1595_s5 = inlined_call_operand.hbm [shape: bf16[128,128], index: 5, kind: input, shape index: {}]   ;;  %s1596_s6 = inlined_call_operand.vmem [shape: f32[1,128], index: 6, kind: input, shape index: {}]   ;;  %s1597_s7 = inlined_call_operand.hbm [shape: bf16[128,128], index: 7, kind: input, shape index: {}]   ;;  %s1598_s8 = inlined_call_operand.vmem [shape: f32[1,128], index: 8, kind: input, shape index: {}]   ;;  %s1599_s9 = inlined_call_operand.hbm [shape: f32[6,128], index: 9, kind: output, shape index: {}]  }
   0x1   :  { %15 = vsyncpa [#allocation6], 0 }
   0x2   :  { %16 = vsyncpa [#allocation9], 0 }
   0x3   :  { %17 = vsyncpa [#allocation4], 0 }
   0x4   :  { %22 = vsyncadd [#allocation3], 1920  ;;  %s1399_s30 = smov [#allocation5]  }
   0x5   :  { %s35_s10 = sshll.u32 %s1399_s30, 4  ;;  %s36_s10 = int_to_ptr.vmem [resolvable:$true] %s35_s10 }
   0x6   :  { %s1279_s11 = scalar_lea.vmem %s36_s10, 512  ;;  %p1284_p1 = scmp.lt.s32.totalorder %s36_s10, %s36_s10 }
   0x7   :  { %p1280_p0 = scmp.ne.s32.totalorder %s36_s10, %s1279_s11  ;;  %p1285_p2 = scmp.lt.s32.totalorder %s1279_s11, %s1279_s11 }
   0x9   :  { %p1286_p3 = por %p1285_p2, %p1284_p1 }
   0xb   :  { %p1287_p4 = pnand %p1286_p3, %p1280_p0 }
   0xd   :  { %1290 = shalt.err (!%p1287_p4)
}
   0xe   :  { %s1400_s12 = smov 128   ;;  %s1401_s13 = smov 8  }
   0xf   :  { %41 = dma.hbm_to_vmem [thread:$0]  %s1591_s1, 512, %s36_s10, [#allocation6], %s1400_s12, %s1400_s12, %s1401_s13  }
  0x10   :  { %s1402_s16 = smov [#allocation8]   ;;  %s1403_s18 = smov [#allocation2]  }
  0x11   :  { %s63_s17 = sshll.u32 %s1402_s16, 4  ;;  %s23_s19 = sshll.u32 %s1403_s18, 4  ;;  %s64_s17 = int_to_ptr.vmem [resolvable:$true] %s63_s17  ;;  %s24_s19 = int_to_ptr.vmem [resolvable:$true] %s23_s19 }
  0x12   :  { %s1299_s20 = scalar_lea.vmem %s64_s17, 1024  ;;  %p1304_p6 = scmp.lt.s32.totalorder %s64_s17, %s64_s17 }
  0x13   :  { %p1300_p5 = scmp.ne.s32.totalorder %s64_s17, %s1299_s20  ;;  %p1305_p7 = scmp.lt.s32.totalorder %s1299_s20, %s1299_s20 }
  0x15   :  { %p1306_p8 = por %p1305_p7, %p1304_p6 }
  0x17   :  { %p1307_p9 = pnand %p1306_p8, %p1300_p5 }
  0x19   :  { %1310 = shalt.err (!%p1307_p9)
}
  0x1a   :  { %s1404_s21 = smov 64   ;;  %s1405_s22 = smov 4  }
  0x1b   :  { %69 = dma.hbm_to_vmem [thread:$0]  %s1595_s5, 1024, %s64_s17, [#allocation9], %s1404_s21, %s1404_s21, %s1405_s22  }
  0x1c   :  { %s1319_s1 = scalar_lea.vmem %s24_s19, 128  ;;  %s1323_s25 = scalar_lea.vmem %s24_s19, 2048 }
  0x1d   :  { %p1320_p10 = scmp.ne.s32.totalorder %s24_s19, %s1319_s1  ;;  %p1324_p11 = scmp.lt.s32.totalorder %s24_s19, %s24_s19 }
  0x1e   :  { %p1325_p12 = scmp.lt.s32.totalorder %s1323_s25, %s1319_s1 }
  0x20   :  { %p1326_p13 = por %p1325_p12, %p1324_p11 }
  0x22   :  { %p1327_p0 = pnand %p1326_p13, %p1320_p10 }
  0x24   :  { %1330 = shalt.err (!%p1327_p0)
}
  0x25   :  { %29 = dma.hbm_to_vmem [thread:$0]  %s1590_s0, 128, %s24_s19, [#allocation3], %s1400_s12, %s1400_s12, %s1401_s13  }
  0x26   :  { %s1406_s28 = smov [#allocation7]   ;;  %s1407_s5 = smov [#allocation10]  }
  0x27   :  { %s49_s29 = sshll.u32 %s1406_s28, 4  ;;  %s77_s30 = sshll.u32 %s1407_s5, 4  ;;  %s50_s29 = int_to_ptr.vmem [resolvable:$true] %s49_s29  ;;  %s78_s30 = int_to_ptr.vmem [resolvable:$true] %s77_s30 }
  0x28   :  { %s1339_s10 = scalar_lea.vmem %s50_s29, 2048  ;;  %p1344_p2 = scmp.lt.s32.totalorder %s50_s29, %s50_s29 }
  0x29   :  { %p1340_p1 = scmp.ne.s32.totalorder %s50_s29, %s1339_s10  ;;  %p1345_p3 = scmp.lt.s32.totalorder %s1339_s10, %s1339_s10 }
  0x2b   :  { %p1346_p4 = por %p1345_p3, %p1344_p2 }
  0x2d   :  { %p1347_p5 = pnand %p1346_p4, %p1340_p1 }
  0x2f   :  { %1350 = shalt.err (!%p1347_p5)
}
  0x30   :  { %55 = dma.hbm_to_vmem [thread:$0]  %s1593_s3, 2048, %s50_s29, [#allocation6], %s1404_s21, %s1404_s21, %s1405_s22  }
  0x31   :  { %s1359_s0 = scalar_lea.vmem %s78_s30, 1024  ;;  %p1364_p7 = scmp.lt.s32.totalorder %s78_s30, %s78_s30 }
  0x32   :  { %p1360_p6 = scmp.ne.s32.totalorder %s78_s30, %s1359_s0  ;;  %p1365_p8 = scmp.lt.s32.totalorder %s1359_s0, %s1359_s0 }
  0x34   :  { %p1366_p9 = por %p1365_p8, %p1364_p7 }
  0x36   :  { %p1367_p10 = pnand %p1366_p9, %p1360_p6 }
  0x38   :  { %1370 = shalt.err (!%p1367_p10)
}
  0x39   :  { %83 = dma.hbm_to_vmem [thread:$0]  %s1597_s7, 1024, %s78_s30, [#allocation9], %s1404_s21, %s1404_s21, %s1405_s22  }
  0x3a   :  { %1391 = dma.done.wait [#allocation3], 2048  }
  0x3b   :  { %1392 = vsyncadd [#allocation3], 4294965248 }
  0x3c   :  { %1393 = dma.done.wait [#allocation6], 2560  }
  0x3d   :  { %1394 = vsyncadd [#allocation6], 4294964736 }
  0x3e   :  { %1395 = dma.done.wait [#allocation9], 2048  }
  0x3f   :  { %1396 = vsyncadd [#allocation9], 4294965248  ;;  %v1408_v0 = vmov 0   ;;  %v1233_v1 = vld [vmem:[#allocation5 + $0x14] ss:$8 sps:$4 sm:$0xff]   ;;  %v102_v5 = vld [vmem:[#allocation2] sm:$0xff]  ;;  %v132_v48 = vlaneseq }
  0x40   :  { %219 = vmatprep.mubr.bf16.mxu0 %v1408_v0  ;;  %v1235_v2 = vld [vmem:[#allocation5 + $0x10] ss:$8 sps:$4 sm:$0xff]   ;;  %199 = vmatprep.subr.bf16.mxu0 %v1233_v1  ;;  %v1236_v3 = vld [vmem:[#allocation5 + $0x4] ss:$8 sps:$4 sm:$0xff]   ;;  %v1238_v4 = vld [vmem:[#allocation5] ss:$8 sps:$4 sm:$0xff]  }
  0x41   :  { %200 = vmatpush1.bf16.msra.mxu0 %v1235_v2  ;;  %v103_v6 = vld [vmem:[#allocation2 + $0x8] sm:$0xff]  ;;  %vm162_vm0 = vcmask 261120   ;;  %v1239_v8 = vld [vmem:[#allocation7 + $0x78] sm:$0xff]   ;;  %v104_v9 = vld [vmem:[#allocation2 + $0x10] sm:$0xff]  ;;  %v133_v49 = vshrl.u32 %v132_v48, 7 }
  0x42   :  { %201 = vmatprep.subr.bf16.mxu0 %v1236_v3  ;;  %v118_v7 = vpack.c.bf16 %v103_v6, %v102_v5  ;;  %v105_v10 = vld [vmem:[#allocation2 + $0x18] sm:$0xff]  ;;  %1046 = vmatprep.subr.bf16.mxu1 %v1239_v8  ;;  %v1241_v12 = vld [vmem:[#allocation7 + $0x70] sm:$0xff]   ;;  %v1243_v14 = vld [vmem:[#allocation7 + $0x68] sm:$0xff]  }
  0x43   :  { %v1240_v11 = vld [vmem:[#allocation7 + $0x38] sm:$0xff]   ;;  %v1242_v13 = vld [vmem:[#allocation7 + $0x30] sm:$0xff]   ;;  %v119_v15 = vpack.c.bf16 %v105_v10, %v104_v9  ;;  %v1244_v16 = vld [vmem:[#allocation7 + $0x28] sm:$0xff]   ;;  %v138_v50 = vsub.s32 1, %v133_v49  ;;  %v134_v51 = vsub.s32 0, %v133_v49 }
  0x44   :  { %1047 = vmatpush3.bf16.msra.mxu1 %v1240_v11  ;;  %v1245_v17 = vld [vmem:[#allocation7 + $0x60] sm:$0xff]   ;;  %v107_v19 = vld [vmem:[#allocation2 + $0x28] sm:$0xff]  ;;  %v1247_v21 = vld [vmem:[#allocation7 + $0x58] sm:$0xff]  }
  0x45   :  { %202 = vmatpush1.bf16.msra.mxu0 %v1238_v4  ;;  %1048 = vmatprep.subr.bf16.mxu1 %v1241_v12  ;;  %v106_v18 = vld [vmem:[#allocation2 + $0x20] sm:$0xff]  ;;  %v1248_v22 = vld [vmem:[#allocation7 + $0x18] sm:$0xff]   ;;  %v108_v24 = vld [vmem:[#allocation2 + $0x30] sm:$0xff] }
  0x46   :  { %v1246_v20 = vld [vmem:[#allocation7 + $0x20] sm:$0xff]   ;;  %v120_v23 = vpack.c.bf16 %v107_v19, %v106_v18  ;;  %v109_v25 = vld [vmem:[#allocation2 + $0x38] sm:$0xff]  ;;  %v111_v28 = vld [vmem:[#allocation2 + $0x48] sm:$0xff] }
  0x47   :  { %v121_v26 = vpack.c.bf16 %v109_v25, %v108_v24  ;;  %v110_v27 = vld [vmem:[#allocation2 + $0x40] sm:$0xff]  ;;  %v112_v30 = vld [vmem:[#allocation2 + $0x50] sm:$0xff]  ;;  %v113_v31 = vld [vmem:[#allocation2 + $0x58] sm:$0xff] }
  0x48   :  { %1003 = vmatmul.mubr.msk.bf16.vlgmr.msra.gmra.mxu0 %vm162_vm0, %v118_v7  ;;  %1049 = vmatpush3.bf16.msra.mxu1 %v1242_v13  ;;  %v122_v29 = vpack.c.bf16 %v111_v28, %v110_v27  ;;  %v123_v32 = vpack.c.bf16 %v113_v31, %v112_v30  ;;  %v114_v33 = vld [vmem:[#allocation2 + $0x60] sm:$0xff]  ;;  %v115_v34 = vld [vmem:[#allocation2 + $0x68] sm:$0xff]  ;;  %v116_v36 = vld [vmem:[#allocation2 + $0x70] sm:$0xff] }
  0x49   :  { %229 = vmatprep.mubr.bf16.mxu0 %v1408_v0  ;;  %1050 = vmatprep.subr.bf16.mxu1 %v1243_v14  ;;  %v124_v35 = vpack.c.bf16 %v115_v34, %v114_v33  ;;  %v117_v37 = vld [vmem:[#allocation2 + $0x78] sm:$0xff]  ;;  %v1249_v39 = vld [vmem:[#allocation7 + $0x50] sm:$0xff]   ;;  %v1251_v41 = vld [vmem:[#allocation7 + $0x48] sm:$0xff]  }
  0x4a   :  { %v125_v38 = vpack.c.bf16 %v117_v37, %v116_v36  ;;  %v1250_v40 = vld [vmem:[#allocation7 + $0x10] sm:$0xff]   ;;  %v1252_v42 = vld [vmem:[#allocation7 + $0x8] sm:$0xff]   ;;  %v1253_v43 = vld [vmem:[#allocation7 + $0x40] sm:$0xff]  }
  0x4b   :  { %v1254_v44 = vld [vmem:[#allocation7] sm:$0xff]   ;;  %v1255_v45 = vld [vmem:[#allocation8 + $0x38] sm:$0xff]   ;;  %v1256_v46 = vld [vmem:[#allocation8 + $0x30] sm:$0xff]  }
  0x4c   :  { %1051 = vmatpush3.bf16.msra.mxu1 %v1244_v16  ;;  %1142 = vmatprep.subr.bf16.mxu0 %v1255_v45  ;;  %v1257_v47 = vld [vmem:[#allocation8 + $0x28] sm:$0xff]   ;;  %v130_v52 = vld [vmem:[%s1592_s2] sm:$0x3] }
  0x4d   :  { %1052 = vmatprep.subr.bf16.mxu1 %v1245_v17  ;;  %1143 = vmatpush3.bf16.msra.mxu0 %v1255_v45  ;;  %v1509_v54 = vrot.slane %v130_v52, %v138_v50  ;;  %v1511_v55 = vrot.slane %v130_v52, %v134_v51 }
  0x4e   :  { %1144 = vmatprep.subr.bf16.mxu0 %v1256_v46 }
  0x50   :  { %1004 = vmatmul.mubr.msk.bf16.gmra.mxu0 %vm162_vm0, %v119_v15  ;;  %1053 = vmatpush3.bf16.msra.mxu1 %v1246_v20 }
  0x51   :  { %239 = vmatprep.mubr.bf16.mxu0 %v1408_v0  ;;  %1054 = vmatprep.subr.bf16.mxu1 %v1247_v21 }
  0x52   :  { %1145 = vmatpush3.bf16.msra.mxu0 %v1256_v46 }
  0x53   :  { %1146 = vmatprep.subr.bf16.mxu0 %v1257_v47 }
  0x54   :  { %1055 = vmatpush3.bf16.msra.mxu1 %v1248_v22 }
  0x55   :  { %1056 = vmatprep.subr.bf16.mxu1 %v1249_v39 }
  0x56   :  { %1147 = vmatpush3.bf16.msra.mxu0 %v1257_v47 }
  0x58   :  { %1005 = vmatmul.mubr.msk.bf16.gmra.mxu0 %vm162_vm0, %v120_v23  ;;  %1057 = vmatpush3.bf16.msra.mxu1 %v1250_v40 }
  0x59   :  { %249 = vmatprep.mubr.bf16.mxu0 %v1408_v0  ;;  %1058 = vmatprep.subr.bf16.mxu1 %v1251_v41 }
  0x5c   :  { %1059 = vmatpush3.bf16.msra.mxu1 %v1252_v42 }
  0x5d   :  { %1060 = vmatprep.subr.bf16.mxu1 %v1253_v43 }
  0x60   :  { %1006 = vmatmul.mubr.msk.bf16.gmra.mxu0 %vm162_vm0, %v121_v26  ;;  %1061 = vmatpush3.bf16.msra.mxu1 %v1254_v44 }
  0x61   :  { %259 = vmatprep.mubr.bf16.mxu0 %v1408_v0 }
  0x68   :  { %1007 = vmatmul.mubr.msk.bf16.gmra.mxu0 %vm162_vm0, %v122_v29 }
  0x69   :  { %269 = vmatprep.mubr.bf16.mxu0 %v1408_v0 }
  0x70   :  { %1008 = vmatmul.mubr.msk.bf16.gmra.mxu0 %vm162_vm0, %v123_v32 }
  0x71   :  { %279 = vmatprep.mubr.bf16.mxu0 %v1408_v0 }
  0x78   :  { %1009 = vmatmul.mubr.msk.bf16.gmra.mxu0 %vm162_vm0, %v124_v35 }
  0x79   :  { %289 = vmatprep.mubr.bf16.mxu0 %v1408_v0 }
  0x80   :  { %1010 = vmatmul.mubr.msk.bf16.gmra.mxu0 %vm162_vm0, %v125_v38 }
 0x108   :  { %v221_v53 = vpop.f32.mrf.mxu0 }
 0x109   :  { %v222_v60 = vadd.f32 %v221_v53, %v1511_v55 }
 0x10a   :  { %v223_v56 = vpop.f32.mrf.mxu0 }
 0x10b   :  { %v224_v58 = vadd.f32 %v223_v56, %v1509_v54  ;;  %v300_v3 = vmax.f32 %v222_v60, 0.0 }
 0x10c   :  { %v225_v57 = vpop.f32.mrf.mxu0 }
 0x10d   :  { %v226_v59 = vadd.f32 %v225_v57, %v1511_v55  ;;  %v301_v1 = vmax.f32 %v224_v58, 0.0 }
 0x10e   :  { %v227_v61 = vpop.f32.mrf.mxu0 }
 0x10f   :  { %v228_v62 = vadd.f32 %v227_v61, %v1509_v54  ;;  %v302_v63 = vmax.f32 %v226_v59, 0.0 }
 0x110   :  { %v231_v0 = vpop.f32.mrf.mxu0 }
 0x111   :  { %v303_v2 = vmax.f32 %v228_v62, 0.0  ;;  %v332_v6 = vpack.c.bf16 %v302_v63, %v300_v3  ;;  %v232_v10 = vadd.f32 %v231_v0, %v1511_v55 }
 0x112   :  { %v233_v4 = vpop.f32.mrf.mxu0 }
 0x113   :  { %v333_v5 = vpack.c.bf16 %v303_v2, %v301_v1  ;;  %v234_v8 = vadd.f32 %v233_v4, %v1509_v54  ;;  %v304_v17 = vmax.f32 %v232_v10, 0.0 }
 0x114   :  { %v235_v7 = vpop.f32.mrf.mxu0 }
 0x115   :  { %v236_v9 = vadd.f32 %v235_v7, %v1511_v55  ;;  %515 = vmatprep.mubr.bf16.mxu1 %v333_v5  ;;  %v305_v15 = vmax.f32 %v234_v8, 0.0 }
 0x116   :  { %v237_v11 = vpop.f32.mrf.mxu0  ;;  %516 = vmatmul.mubr.bf16.vlgmr.msra.gmra.mxu1 %v332_v6 }
 0x117   :  { %v238_v12 = vadd.f32 %v237_v11, %v1509_v54  ;;  %v306_v13 = vmax.f32 %v236_v9, 0.0 }
 0x118   :  { %v241_v14 = vpop.f32.mrf.mxu0 }
 0x119   :  { %v307_v16 = vmax.f32 %v238_v12, 0.0  ;;  %v334_v20 = vpack.c.bf16 %v306_v13, %v304_v17  ;;  %v242_v24 = vadd.f32 %v241_v14, %v1511_v55 }
 0x11a   :  { %v243_v18 = vpop.f32.mrf.mxu0 }
 0x11b   :  { %v335_v19 = vpack.c.bf16 %v307_v16, %v305_v15  ;;  %v244_v22 = vadd.f32 %v243_v18, %v1509_v54  ;;  %v308_v31 = vmax.f32 %v242_v24, 0.0 }
 0x11c   :  { %v245_v21 = vpop.f32.mrf.mxu0 }
 0x11d   :  { %v246_v23 = vadd.f32 %v245_v21, %v1511_v55  ;;  %523 = vmatprep.mubr.bf16.mxu1 %v335_v19  ;;  %v309_v29 = vmax.f32 %v244_v22, 0.0 }
 0x11e   :  { %v247_v25 = vpop.f32.mrf.mxu0  ;;  %524 = vmatmul.mubr.bf16.gmra.mxu1 %v334_v20 }
 0x11f   :  { %v248_v26 = vadd.f32 %v247_v25, %v1509_v54  ;;  %v310_v27 = vmax.f32 %v246_v23, 0.0 }
 0x120   :  { %v251_v28 = vpop.f32.mrf.mxu0 }
 0x121   :  { %v311_v30 = vmax.f32 %v248_v26, 0.0  ;;  %v336_v34 = vpack.c.bf16 %v310_v27, %v308_v31  ;;  %v252_v38 = vadd.f32 %v251_v28, %v1511_v55 }
 0x122   :  { %v253_v32 = vpop.f32.mrf.mxu0 }
 0x123   :  { %v337_v33 = vpack.c.bf16 %v311_v30, %v309_v29  ;;  %v254_v36 = vadd.f32 %v253_v32, %v1509_v54  ;;  %v312_v45 = vmax.f32 %v252_v38, 0.0 }
 0x124   :  { %v255_v35 = vpop.f32.mrf.mxu0 }
 0x125   :  { %v256_v37 = vadd.f32 %v255_v35, %v1511_v55  ;;  %531 = vmatprep.mubr.bf16.mxu1 %v337_v33  ;;  %v313_v43 = vmax.f32 %v254_v36, 0.0 }
 0x126   :  { %v257_v39 = vpop.f32.mrf.mxu0  ;;  %532 = vmatmul.mubr.bf16.gmra.mxu1 %v336_v34 }
 0x127   :  { %v258_v40 = vadd.f32 %v257_v39, %v1509_v54  ;;  %v314_v41 = vmax.f32 %v256_v37, 0.0 }
 0x128   :  { %v261_v42 = vpop.f32.mrf.mxu0 }
 0x129   :  { %v315_v44 = vmax.f32 %v258_v40, 0.0  ;;  %v338_v48 = vpack.c.bf16 %v314_v41, %v312_v45  ;;  %v262_v52 = vadd.f32 %v261_v42, %v1511_v55  ;;  %v1258_v41 = vld [vmem:[#allocation8 + $0x20] sm:$0xff]   ;;  %v1259_v42 = vld [vmem:[#allocation8 + $0x18] sm:$0xff]   ;;  %v1264_v45 = vld [vmem:[#allocation10 + $0x30] sm:$0xff]  }
 0x12a   :  { %v263_v46 = vpop.f32.mrf.mxu0  ;;  %1148 = vmatprep.subr.bf16.mxu0 %v1258_v41 }
 0x12b   :  { %v339_v47 = vpack.c.bf16 %v315_v44, %v313_v43  ;;  %v264_v50 = vadd.f32 %v263_v46, %v1509_v54  ;;  %v316_v61 = vmax.f32 %v262_v52, 0.0  ;;  %1149 = vmatpush3.bf16.msra.mxu0 %v1258_v41  ;;  %v1260_v43 = vld [vmem:[#allocation8 + $0x10] sm:$0xff]   ;;  %v1263_v44 = vld [vmem:[#allocation10 + $0x38] sm:$0xff]   ;;  %v1265_v46 = vld [vmem:[#allocation10 + $0x28] sm:$0xff]  }
 0x12c   :  { %v265_v49 = vpop.f32.mrf.mxu0  ;;  %1150 = vmatprep.subr.bf16.mxu0 %v1259_v42  ;;  %1206 = vmatprep.subr.bf16.mxu1 %v1263_v44  ;;  %v1556_v52 = vld [vmem:[%s1594_s4] ss:$0 sm:$0xff] }
 0x12d   :  { %v266_v51 = vadd.f32 %v265_v49, %v1511_v55  ;;  %539 = vmatprep.mubr.bf16.mxu1 %v339_v47  ;;  %v317_v59 = vmax.f32 %v264_v50, 0.0  ;;  %1214 = vmatpush3.bf16.msra.mxu1 %v1263_v44  ;;  %v1545_v47 = vld [vmem:[#allocation10 + $0x20] sm:$0xff]  }
 0x12e   :  { %v267_v53 = vpop.f32.mrf.mxu0  ;;  %540 = vmatmul.mubr.bf16.gmra.mxu1 %v338_v48  ;;  %1207 = vmatprep.subr.bf16.mxu1 %v1264_v45  ;;  %v1548_v48 = vld [vmem:[#allocation10 + $0x18] sm:$0xff]  }
 0x12f   :  { %v268_v56 = vadd.f32 %v267_v53, %v1509_v54  ;;  %v318_v57 = vmax.f32 %v266_v51, 0.0  ;;  %1151 = vmatpush3.bf16.msra.mxu0 %v1259_v42 }
 0x130   :  { %v271_v58 = vpop.f32.mrf.mxu0  ;;  %1152 = vmatprep.subr.bf16.mxu0 %v1260_v43 }
 0x131   :  { %v319_v60 = vmax.f32 %v268_v56, 0.0  ;;  %v340_v0 = vpack.c.bf16 %v318_v57, %v316_v61  ;;  %v272_v4 = vadd.f32 %v271_v58, %v1511_v55  ;;  %1215 = vmatpush3.bf16.msra.mxu1 %v1264_v45 }
 0x132   :  { %v273_v62 = vpop.f32.mrf.mxu0  ;;  %1208 = vmatprep.subr.bf16.mxu1 %v1265_v46 }
 0x133   :  { %v341_v63 = vpack.c.bf16 %v319_v60, %v317_v59  ;;  %v274_v2 = vadd.f32 %v273_v62, %v1509_v54  ;;  %v320_v11 = vmax.f32 %v272_v4, 0.0  ;;  %1153 = vmatpush3.bf16.msra.mxu0 %v1260_v43 }
 0x134   :  { %v275_v1 = vpop.f32.mrf.mxu0 }
 0x135   :  { %v276_v3 = vadd.f32 %v275_v1, %v1511_v55  ;;  %547 = vmatprep.mubr.bf16.mxu1 %v341_v63  ;;  %v321_v9 = vmax.f32 %v274_v2, 0.0  ;;  %1216 = vmatpush3.bf16.msra.mxu1 %v1265_v46 }
 0x136   :  { %v277_v5 = vpop.f32.mrf.mxu0  ;;  %548 = vmatmul.mubr.bf16.gmra.mxu1 %v340_v0  ;;  %1209 = vmatprep.subr.bf16.mxu1 %v1545_v47 }
 0x137   :  { %v278_v6 = vadd.f32 %v277_v5, %v1509_v54  ;;  %v322_v7 = vmax.f32 %v276_v3, 0.0 }
 0x138   :  { %v281_v8 = vpop.f32.mrf.mxu0 }
 0x139   :  { %v323_v10 = vmax.f32 %v278_v6, 0.0  ;;  %v342_v14 = vpack.c.bf16 %v322_v7, %v320_v11  ;;  %v282_v18 = vadd.f32 %v281_v8, %v1511_v55  ;;  %1217 = vmatpush3.bf16.msra.mxu1 %v1545_v47 }
 0x13a   :  { %v283_v12 = vpop.f32.mrf.mxu0  ;;  %1210 = vmatprep.subr.bf16.mxu1 %v1548_v48 }
 0x13b   :  { %v343_v13 = vpack.c.bf16 %v323_v10, %v321_v9  ;;  %v284_v16 = vadd.f32 %v283_v12, %v1509_v54  ;;  %v324_v25 = vmax.f32 %v282_v18, 0.0 }
 0x13c   :  { %v285_v15 = vpop.f32.mrf.mxu0 }
 0x13d   :  { %v286_v17 = vadd.f32 %v285_v15, %v1511_v55  ;;  %555 = vmatprep.mubr.bf16.mxu1 %v343_v13  ;;  %v325_v23 = vmax.f32 %v284_v16, 0.0  ;;  %1218 = vmatpush3.bf16.msra.mxu1 %v1548_v48 }
 0x13e   :  { %v287_v19 = vpop.f32.mrf.mxu0  ;;  %556 = vmatmul.mubr.bf16.gmra.mxu1 %v342_v14 }
 0x13f   :  { %v288_v20 = vadd.f32 %v287_v19, %v1509_v54  ;;  %v326_v21 = vmax.f32 %v286_v17, 0.0 }
 0x140   :  { %v291_v22 = vpop.f32.mrf.mxu0 }
 0x141   :  { %v327_v24 = vmax.f32 %v288_v20, 0.0  ;;  %v344_v28 = vpack.c.bf16 %v326_v21, %v324_v25  ;;  %v292_v32 = vadd.f32 %v291_v22, %v1511_v55 }
 0x142   :  { %v293_v26 = vpop.f32.mrf.mxu0 }
 0x143   :  { %v345_v27 = vpack.c.bf16 %v327_v24, %v325_v23  ;;  %v294_v30 = vadd.f32 %v293_v26, %v1509_v54  ;;  %v328_v38 = vmax.f32 %v292_v32, 0.0 }
 0x144   :  { %v295_v29 = vpop.f32.mrf.mxu0 }
 0x145   :  { %v296_v31 = vadd.f32 %v295_v29, %v1511_v55  ;;  %563 = vmatprep.mubr.bf16.mxu1 %v345_v27  ;;  %v329_v36 = vmax.f32 %v294_v30, 0.0  ;;  %v1261_v55 = vld [vmem:[#allocation8 + $0x8] sm:$0xff]  }
 0x146   :  { %v297_v33 = vpop.f32.mrf.mxu0  ;;  %564 = vmatmul.mubr.bf16.gmra.mxu1 %v344_v28  ;;  %1154 = vmatprep.subr.bf16.mxu0 %v1261_v55 }
 0x147   :  { %v298_v34 = vadd.f32 %v297_v33, %v1509_v54  ;;  %v330_v35 = vmax.f32 %v296_v31, 0.0  ;;  %1155 = vmatpush3.bf16.msra.mxu0 %v1261_v55  ;;  %v1262_v54 = vld [vmem:[#allocation8] sm:$0xff]  }
 0x148   :  { %1156 = vmatprep.subr.bf16.mxu0 %v1262_v54 }
 0x149   :  { %v331_v37 = vmax.f32 %v298_v34, 0.0  ;;  %v346_v40 = vpack.c.bf16 %v330_v35, %v328_v38 }
 0x14b   :  { %v347_v39 = vpack.c.bf16 %v331_v37, %v329_v36  ;;  %1157 = vmatpush3.bf16.msra.mxu0 %v1262_v54 }
 0x14c   :  { %1174 = vmatprep.subr.bf16.mxu0 %v1263_v44 }
 0x14d   :  { %571 = vmatprep.mubr.bf16.mxu1 %v347_v39 }
 0x14e   :  { %572 = vmatmul.mubr.bf16.gmra.mxu1 %v346_v40 }
 0x1d6   :  { %v1062_v49 = vpop.f32.mrf.mxu1 }
 0x1d8   :  { %v1063_v50 = vpop.f32.mrf.mxu1 }
 0x1d9   :  { %v1064_v51 = vadd.f32 %v1063_v50, %v1062_v49 }
 0x1da   :  { %v1065_v53 = vpop.f32.mrf.mxu1 }
 0x1db   :  { %v518_v57 = vadd.f32 %v1064_v51, %v1556_v52 }
 0x1dc   :  { %v1066_v56 = vpop.f32.mrf.mxu1 }
 0x1dd   :  { %v1067_v58 = vadd.f32 %v1066_v56, %v1065_v53  ;;  %v580_v62 = vmax.f32 %v518_v57, 0.0 }
 0x1de   :  { %v1068_v59 = vpop.f32.mrf.mxu1 }
 0x1df   :  { %v521_v60 = vadd.f32 %v1067_v58, %v1556_v52 }
 0x1e0   :  { %v1069_v61 = vpop.f32.mrf.mxu1 }
 0x1e1   :  { %v581_v63 = vmax.f32 %v521_v60, 0.0  ;;  %v1070_v0 = vadd.f32 %v1069_v61, %v1068_v59 }
 0x1e2   :  { %v1071_v1 = vpop.f32.mrf.mxu1 }
 0x1e3   :  { %v596_v2 = vpack.c.bf16 %v581_v63, %v580_v62  ;;  %v526_v4 = vadd.f32 %v1070_v0, %v1556_v52 }
 0x1e4   :  { %v1072_v3 = vpop.f32.mrf.mxu1 }
 0x1e5   :  { %v1073_v5 = vadd.f32 %v1072_v3, %v1071_v1  ;;  %1158 = vmatprep.mubr.bf16.mxu0 %v596_v2  ;;  %v582_v9 = vmax.f32 %v526_v4, 0.0 }
 0x1e6   :  { %v1074_v6 = vpop.f32.mrf.mxu1 }
 0x1e7   :  { %v529_v7 = vadd.f32 %v1073_v5, %v1556_v52 }
 0x1e8   :  { %v1075_v8 = vpop.f32.mrf.mxu1 }
 0x1e9   :  { %v583_v10 = vmax.f32 %v529_v7, 0.0  ;;  %v1076_v11 = vadd.f32 %v1075_v8, %v1074_v6 }
 0x1ea   :  { %v1077_v12 = vpop.f32.mrf.mxu1 }
 0x1eb   :  { %v597_v13 = vpack.c.bf16 %v583_v10, %v582_v9  ;;  %v534_v15 = vadd.f32 %v1076_v11, %v1556_v52 }
 0x1ec   :  { %v1078_v14 = vpop.f32.mrf.mxu1 }
 0x1ed   :  { %v1079_v16 = vadd.f32 %v1078_v14, %v1077_v12  ;;  %1159 = vmatmul.mubr.bf16.vlgmr.msra.gmra.mxu0 %v597_v13  ;;  %v584_v20 = vmax.f32 %v534_v15, 0.0  ;;  %v1268_v13 = vld [vmem:[#allocation10 + $0x10] sm:$0xff]   ;;  %v1269_v14 = vld [vmem:[#allocation10 + $0x8] sm:$0xff]   ;;  %v1270_v15 = vld [vmem:[#allocation10] sm:$0xff]  }
 0x1ee   :  { %v1080_v17 = vpop.f32.mrf.mxu1  ;;  %1175 = vmatpush3.bf16.msra.mxu0 %v1263_v44  ;;  %1211 = vmatprep.subr.bf16.mxu1 %v1268_v13 }
 0x1ef   :  { %v537_v18 = vadd.f32 %v1079_v16, %v1556_v52  ;;  %1176 = vmatprep.subr.bf16.mxu0 %v1264_v45  ;;  %1219 = vmatpush3.bf16.msra.mxu1 %v1268_v13 }
 0x1f0   :  { %v1081_v19 = vpop.f32.mrf.mxu1  ;;  %1212 = vmatprep.subr.bf16.mxu1 %v1269_v14 }
 0x1f1   :  { %v585_v21 = vmax.f32 %v537_v18, 0.0  ;;  %v1082_v22 = vadd.f32 %v1081_v19, %v1080_v17  ;;  %v1028_v17 = vld [vmem:[%s1596_s6] ss:$0 sm:$0xff] }
 0x1f2   :  { %v1083_v23 = vpop.f32.mrf.mxu1  ;;  %1177 = vmatpush3.bf16.msra.mxu0 %v1264_v45 }
 0x1f3   :  { %v598_v24 = vpack.c.bf16 %v585_v21, %v584_v20  ;;  %1178 = vmatprep.subr.bf16.mxu0 %v1265_v46  ;;  %v542_v26 = vadd.f32 %v1082_v22, %v1556_v52  ;;  %1220 = vmatpush3.bf16.msra.mxu1 %v1269_v14 }
 0x1f4   :  { %v1084_v25 = vpop.f32.mrf.mxu1  ;;  %1213 = vmatprep.subr.bf16.mxu1 %v1270_v15 }
 0x1f5   :  { %v1085_v27 = vadd.f32 %v1084_v25, %v1083_v23  ;;  %1162 = vmatprep.mubr.bf16.mxu0 %v598_v24  ;;  %v586_v31 = vmax.f32 %v542_v26, 0.0 }
 0x1f6   :  { %v1086_v28 = vpop.f32.mrf.mxu1  ;;  %1179 = vmatpush3.bf16.msra.mxu0 %v1265_v46 }
 0x1f7   :  { %v545_v29 = vadd.f32 %v1085_v27, %v1556_v52  ;;  %1180 = vmatprep.subr.bf16.mxu0 %v1545_v47  ;;  %1221 = vmatpush3.bf16.msra.mxu1 %v1270_v15 }
 0x1f8   :  { %v1087_v30 = vpop.f32.mrf.mxu1 }
 0x1f9   :  { %v587_v32 = vmax.f32 %v545_v29, 0.0  ;;  %v1088_v33 = vadd.f32 %v1087_v30, %v1086_v28 }
 0x1fa   :  { %v1089_v34 = vpop.f32.mrf.mxu1  ;;  %1181 = vmatpush3.bf16.msra.mxu0 %v1545_v47 }
 0x1fb   :  { %v599_v35 = vpack.c.bf16 %v587_v32, %v586_v31  ;;  %1182 = vmatprep.subr.bf16.mxu0 %v1548_v48  ;;  %v550_v37 = vadd.f32 %v1088_v33, %v1556_v52 }
 0x1fc   :  { %v1090_v36 = vpop.f32.mrf.mxu1 }
 0x1fd   :  { %v1091_v38 = vadd.f32 %v1090_v36, %v1089_v34  ;;  %1163 = vmatmul.mubr.bf16.gmra.mxu0 %v599_v35  ;;  %v588_v42 = vmax.f32 %v550_v37, 0.0 }
 0x1fe   :  { %v1092_v39 = vpop.f32.mrf.mxu1  ;;  %1183 = vmatpush3.bf16.msra.mxu0 %v1548_v48 }
 0x1ff   :  { %v553_v40 = vadd.f32 %v1091_v38, %v1556_v52  ;;  %1184 = vmatprep.subr.bf16.mxu0 %v1268_v13 }
 0x200   :  { %v1093_v41 = vpop.f32.mrf.mxu1 }
 0x201   :  { %v589_v43 = vmax.f32 %v553_v40, 0.0  ;;  %v1094_v55 = vadd.f32 %v1093_v41, %v1092_v39 }
 0x202   :  { %v1095_v54 = vpop.f32.mrf.mxu1  ;;  %1185 = vmatpush3.bf16.msra.mxu0 %v1268_v13 }
 0x203   :  { %v600_v44 = vpack.c.bf16 %v589_v43, %v588_v42  ;;  %v558_v46 = vadd.f32 %v1094_v55, %v1556_v52  ;;  %1186 = vmatprep.subr.bf16.mxu0 %v1269_v14 }
 0x204   :  { %v1096_v45 = vpop.f32.mrf.mxu1 }
 0x205   :  { %v1097_v47 = vadd.f32 %v1096_v45, %v1095_v54  ;;  %1166 = vmatprep.mubr.bf16.mxu0 %v600_v44  ;;  %v590_v53 = vmax.f32 %v558_v46, 0.0 }
 0x206   :  { %v1098_v49 = vpop.f32.mrf.mxu1  ;;  %1187 = vmatpush3.bf16.msra.mxu0 %v1269_v14 }
 0x207   :  { %v561_v50 = vadd.f32 %v1097_v47, %v1556_v52  ;;  %1188 = vmatprep.subr.bf16.mxu0 %v1270_v15 }
 0x208   :  { %v1099_v51 = vpop.f32.mrf.mxu1 }
 0x209   :  { %v591_v56 = vmax.f32 %v561_v50, 0.0  ;;  %v1100_v48 = vadd.f32 %v1099_v51, %v1098_v49 }
 0x20a   :  { %v1101_v57 = vpop.f32.mrf.mxu1  ;;  %1189 = vmatpush3.bf16.msra.mxu0 %v1270_v15 }
 0x20b   :  { %v601_v58 = vpack.c.bf16 %v591_v56, %v590_v53  ;;  %v566_v60 = vadd.f32 %v1100_v48, %v1556_v52 }
 0x20c   :  { %v1102_v59 = vpop.f32.mrf.mxu1 }
 0x20d   :  { %v1103_v61 = vadd.f32 %v1102_v59, %v1101_v57  ;;  %1167 = vmatmul.mubr.bf16.gmra.mxu0 %v601_v58  ;;  %v592_v1 = vmax.f32 %v566_v60, 0.0 }
 0x20e   :  { %v1104_v62 = vpop.f32.mrf.mxu1 }
 0x20f   :  { %v569_v63 = vadd.f32 %v1103_v61, %v1556_v52 }
 0x210   :  { %v1105_v0 = vpop.f32.mrf.mxu1 }
 0x211   :  { %v593_v2 = vmax.f32 %v569_v63, 0.0  ;;  %v1106_v3 = vadd.f32 %v1105_v0, %v1104_v62 }
 0x212   :  { %v1107_v4 = vpop.f32.mrf.mxu1 }
 0x213   :  { %v602_v5 = vpack.c.bf16 %v593_v2, %v592_v1  ;;  %v574_v7 = vadd.f32 %v1106_v3, %v1556_v52 }
 0x214   :  { %v1108_v6 = vpop.f32.mrf.mxu1 }
 0x215   :  { %v1109_v8 = vadd.f32 %v1108_v6, %v1107_v4  ;;  %1170 = vmatprep.mubr.bf16.mxu0 %v602_v5  ;;  %v594_v10 = vmax.f32 %v574_v7, 0.0 }
 0x217   :  { %v577_v9 = vadd.f32 %v1109_v8, %v1556_v52 }
 0x219   :  { %v595_v11 = vmax.f32 %v577_v9, 0.0  ;;  %v1037_v9 = vld [vmem:[%s1598_s8] ss:$0 sm:$0xff] }
 0x21b   :  { %v603_v12 = vpack.c.bf16 %v595_v11, %v594_v10 }
 0x21d   :  { %1171 = vmatmul.mubr.bf16.gmra.mxu0 %v603_v12 }
 0x2ad   :  { %v1160_v52 = vpop.f32.mrf.mxu0 }
 0x2ae   :  { %v718_v21 = vadd.f32 %v1160_v52, %v1028_v17 }
 0x2af   :  { %v709_v16 = vpop.f32.mrf.mxu0 }
 0x2b0   :  { %v710_v19 = vadd.f32 %v1028_v17, %v709_v16  ;;  %v774_v27 = vmax.f32 %v718_v21, 0.0 }
 0x2b1   :  { %v1161_v18 = vpop.f32.mrf.mxu0 }
 0x2b2   :  { %v721_v20 = vadd.f32 %v1161_v18, %v1028_v17  ;;  %v772_v25 = vmax.f32 %v710_v19, 0.0 }
 0x2b3   :  { %v712_v22 = vpop.f32.mrf.mxu0 }
 0x2b4   :  { %v713_v23 = vadd.f32 %v1028_v17, %v712_v22  ;;  %v775_v24 = vmax.f32 %v721_v20, 0.0 }
 0x2b6   :  { %v773_v26 = vmax.f32 %v713_v23, 0.0  ;;  %v789_v29 = vpack.c.bf16 %v775_v24, %v774_v27 }
 0x2b8   :  { %v788_v28 = vpack.c.bf16 %v773_v26, %v772_v25 }
 0x2ba   :  { %1190 = vmatprep.mubr.bf16.mxu0 %v788_v28 }
 0x2bb   :  { %1191 = vmatmul.mubr.bf16.vlgmr.msra.gmra.mxu0 %v789_v29 }
 0x2bd   :  { %v1164_v30 = vpop.f32.mrf.mxu0 }
 0x2be   :  { %v734_v35 = vadd.f32 %v1164_v30, %v1028_v17 }
 0x2bf   :  { %v725_v31 = vpop.f32.mrf.mxu0 }
 0x2c0   :  { %v726_v33 = vadd.f32 %v1028_v17, %v725_v31  ;;  %v778_v41 = vmax.f32 %v734_v35, 0.0 }
 0x2c1   :  { %v1165_v32 = vpop.f32.mrf.mxu0 }
 0x2c2   :  { %v737_v34 = vadd.f32 %v1165_v32, %v1028_v17  ;;  %v776_v39 = vmax.f32 %v726_v33, 0.0 }
 0x2c3   :  { %v728_v36 = vpop.f32.mrf.mxu0 }
 0x2c4   :  { %v729_v37 = vadd.f32 %v1028_v17, %v728_v36  ;;  %v779_v38 = vmax.f32 %v737_v34, 0.0 }
 0x2c6   :  { %v777_v40 = vmax.f32 %v729_v37, 0.0  ;;  %v791_v43 = vpack.c.bf16 %v779_v38, %v778_v41 }
 0x2c8   :  { %v790_v42 = vpack.c.bf16 %v777_v40, %v776_v39 }
 0x2ca   :  { %1194 = vmatprep.mubr.bf16.mxu1 %v790_v42 }
 0x2cb   :  { %1195 = vmatmul.mubr.bf16.vlgmr.msra.gmra.mxu1 %v791_v43 }
 0x2cd   :  { %v1168_v55 = vpop.f32.mrf.mxu0 }
 0x2ce   :  { %v750_v47 = vadd.f32 %v1168_v55, %v1028_v17 }
 0x2cf   :  { %v741_v54 = vpop.f32.mrf.mxu0 }
 0x2d0   :  { %v742_v45 = vadd.f32 %v1028_v17, %v741_v54  ;;  %v782_v48 = vmax.f32 %v750_v47, 0.0 }
 0x2d1   :  { %v1169_v44 = vpop.f32.mrf.mxu0 }
 0x2d2   :  { %v753_v46 = vadd.f32 %v1169_v44, %v1028_v17  ;;  %v780_v53 = vmax.f32 %v742_v45, 0.0 }
 0x2d3   :  { %v744_v49 = vpop.f32.mrf.mxu0 }
 0x2d4   :  { %v745_v50 = vadd.f32 %v1028_v17, %v744_v49  ;;  %v783_v51 = vmax.f32 %v753_v46, 0.0 }
 0x2d6   :  { %v781_v56 = vmax.f32 %v745_v50, 0.0  ;;  %v793_v58 = vpack.c.bf16 %v783_v51, %v782_v48 }
 0x2d8   :  { %v792_v57 = vpack.c.bf16 %v781_v56, %v780_v53 }
 0x2da   :  { %1198 = vmatprep.mubr.bf16.mxu1 %v792_v57 }
 0x2db   :  { %1199 = vmatmul.mubr.bf16.gmra.mxu1 %v793_v58 }
 0x2dd   :  { %v1172_v59 = vpop.f32.mrf.mxu0 }
 0x2de   :  { %v766_v0 = vadd.f32 %v1172_v59, %v1028_v17 }
 0x2df   :  { %v757_v60 = vpop.f32.mrf.mxu0 }
 0x2e0   :  { %v758_v62 = vadd.f32 %v1028_v17, %v757_v60  ;;  %v786_v6 = vmax.f32 %v766_v0, 0.0 }
 0x2e1   :  { %v1173_v61 = vpop.f32.mrf.mxu0 }
 0x2e2   :  { %v769_v63 = vadd.f32 %v1173_v61, %v1028_v17  ;;  %v784_v4 = vmax.f32 %v758_v62, 0.0 }
 0x2e3   :  { %v760_v1 = vpop.f32.mrf.mxu0 }
 0x2e4   :  { %v761_v2 = vadd.f32 %v1028_v17, %v760_v1  ;;  %v787_v3 = vmax.f32 %v769_v63, 0.0 }
 0x2e6   :  { %v785_v5 = vmax.f32 %v761_v2, 0.0  ;;  %v795_v8 = vpack.c.bf16 %v787_v3, %v786_v6 }
 0x2e8   :  { %v794_v7 = vpack.c.bf16 %v785_v5, %v784_v4 }
 0x2ea   :  { %1202 = vmatprep.mubr.bf16.mxu1 %v794_v7 }
 0x2eb   :  { %1203 = vmatmul.mubr.bf16.gmra.mxu1 %v795_v8 }
 0x37b   :  { %v1192_v10 = vpop.f32.mrf.mxu0 }
 0x37c   :  { %v910_v11 = vadd.f32 %v1192_v10, %v1037_v9 }
 0x37d   :  { %v901_v12 = vpop.f32.mrf.mxu0 }
 0x37e   :  { %966 = vst [vmem:[#allocation11 + $0x10] sm:$0xff] %v910_v11  ;;  %v902_v13 = vadd.f32 %v1037_v9, %v901_v12 }
 0x37f   :  { %v1193_v14 = vpop.f32.mrf.mxu0 }
 0x380   :  { %964 = vst [vmem:[#allocation11] sm:$0xff] %v902_v13  ;;  %v913_v15 = vadd.f32 %v1193_v14, %v1037_v9 }
 0x381   :  { %v904_v52 = vpop.f32.mrf.mxu0 }
 0x382   :  { %967 = vst [vmem:[#allocation11 + $0x18] sm:$0xff] %v913_v15  ;;  %v905_v16 = vadd.f32 %v1037_v9, %v904_v52 }
 0x384   :  { %965 = vst [vmem:[#allocation11 + $0x8] sm:$0xff] %v905_v16 }
 0x38b   :  { %v1196_v17 = vpop.f32.mrf.mxu1 }
 0x38c   :  { %v926_v18 = vadd.f32 %v1196_v17, %v1037_v9 }
 0x38d   :  { %v917_v19 = vpop.f32.mrf.mxu1 }
 0x38e   :  { %970 = vst [vmem:[#allocation11 + $0x30] sm:$0xff] %v926_v18  ;;  %v918_v20 = vadd.f32 %v1037_v9, %v917_v19 }
 0x38f   :  { %v1197_v21 = vpop.f32.mrf.mxu1 }
 0x390   :  { %968 = vst [vmem:[#allocation11 + $0x20] sm:$0xff] %v918_v20  ;;  %v929_v22 = vadd.f32 %v1197_v21, %v1037_v9 }
 0x391   :  { %v920_v23 = vpop.f32.mrf.mxu1 }
 0x392   :  { %971 = vst [vmem:[#allocation11 + $0x38] sm:$0xff] %v929_v22  ;;  %v921_v24 = vadd.f32 %v1037_v9, %v920_v23 }
 0x394   :  { %969 = vst [vmem:[#allocation11 + $0x28] sm:$0xff] %v921_v24 }
 0x39b   :  { %v1200_v25 = vpop.f32.mrf.mxu1 }
 0x39c   :  { %v942_v26 = vadd.f32 %v1200_v25, %v1037_v9 }
 0x39d   :  { %v933_v27 = vpop.f32.mrf.mxu1 }
 0x39e   :  { %974 = vst [vmem:[#allocation11 + $0x50] sm:$0xff] %v942_v26  ;;  %v934_v28 = vadd.f32 %v1037_v9, %v933_v27 }
 0x39f   :  { %v1201_v29 = vpop.f32.mrf.mxu1 }
 0x3a0   :  { %972 = vst [vmem:[#allocation11 + $0x40] sm:$0xff] %v934_v28  ;;  %v945_v30 = vadd.f32 %v1201_v29, %v1037_v9 }
 0x3a1   :  { %v936_v31 = vpop.f32.mrf.mxu1 }
 0x3a2   :  { %975 = vst [vmem:[#allocation11 + $0x58] sm:$0xff] %v945_v30  ;;  %v937_v32 = vadd.f32 %v1037_v9, %v936_v31 }
 0x3a4   :  { %973 = vst [vmem:[#allocation11 + $0x48] sm:$0xff] %v937_v32 }
 0x3ab   :  { %v1204_v33 = vpop.f32.mrf.mxu1 }
 0x3ac   :  { %v958_v34 = vadd.f32 %v1204_v33, %v1037_v9 }
 0x3ad   :  { %v949_v35 = vpop.f32.mrf.mxu1 }
 0x3ae   :  { %978 = vst [vmem:[#allocation11 + $0x70] sm:$0xff] %v958_v34  ;;  %v950_v36 = vadd.f32 %v1037_v9, %v949_v35 }
 0x3af   :  { %v1205_v37 = vpop.f32.mrf.mxu1 }
 0x3b0   :  { %976 = vst [vmem:[#allocation11 + $0x60] sm:$0xff] %v950_v36  ;;  %v961_v38 = vadd.f32 %v1205_v37, %v1037_v9 }
 0x3b1   :  { %v952_v39 = vpop.f32.mrf.mxu1 }
 0x3b2   :  { %979 = vst [vmem:[#allocation11 + $0x78] sm:$0xff] %v961_v38  ;;  %v953_v40 = vadd.f32 %v1037_v9, %v952_v39 }
 0x3b4   :  { %977 = vst [vmem:[#allocation11 + $0x68] sm:$0xff] %v953_v40 }
 0x3b5   :  { %984 = vsyncadd [#allocation4], 1920  ;;  %s1409_s8 = smov [#allocation11]  }
 0x3b6   :  { %s985_s20 = sshll.u32 %s1409_s8, 4  ;;  %s986_s20 = int_to_ptr.vmem [resolvable:$true] %s985_s20 }
 0x3b7   :  { %s1371_s21 = scalar_lea.vmem %s986_s20, 128  ;;  %s1375_s22 = scalar_lea.vmem %s986_s20, 2048 }
 0x3b8   :  { %p1372_p11 = scmp.ne.s32.totalorder %s986_s20, %s1371_s21  ;;  %p1376_p12 = scmp.lt.s32.totalorder %s986_s20, %s986_s20 }
 0x3b9   :  { %p1377_p13 = scmp.lt.s32.totalorder %s1375_s22, %s1371_s21 }
 0x3bb   :  { %p1378_p0 = por %p1377_p13, %p1376_p12 }
 0x3bd   :  { %p1379_p1 = pnand %p1378_p0, %p1372_p11 }
 0x3bf   :  { %1382 = shalt.err (!%p1379_p1)
}
 0x3c0   :  { %991 = dma.vmem_to_hbm [thread:$0]  %s986_s20, 128, %s1599_s9, [#allocation4], %s1400_s12, %s1400_s12, %s1401_s13  }
 0x3c1   :  { %1397 = dma.done.wait [#allocation4], 2048  }
 0x3c2   :  { %1398 = vsyncadd [#allocation4], 4294965248 }
 0x3c3   :  { %995 = vsyncpa [#allocation3], 1 }
 0x3c4   :  { %996 = vsyncpa [#allocation6], 1 }
 0x3c5   :  { %997 = vsyncpa [#allocation9], 1 }
 0x3c6   :  { %998 = vsyncpa [#allocation4], 1 }

</bundles_post_ra>
